<compile_context>
chip_gen: v6e
topology: v6e:2x2x1
jax: 0.10.0
libtpu: 0.0.40
codegen_flags: <defaults>
</compile_context>

<pallas_src>
import functools

import jax
import jax.numpy as jnp
from jax.experimental import pallas as pl
from jax.experimental.pallas import tpu as pltpu

_LANE = 128
_SUBLANE = 8

_PER_BUF_TARGET = 2 * 1024 * 1024   # per-buffer sweet spot (measured 1-4 MiB -> 85%+ roofline)
_MIN_SPLIT_BUF = 1 * 1024 * 1024    # never shrink below this just to add grid steps
_MIN_GRID_STEPS = 4                 # keep both v7x TensorCores fed
_VMEM_LIMIT = 32 * 1024 * 1024      # safe scoped limit on v5e/v6e (128 MiB) and v7x (64 MiB)


def _layernorm_kernel(x_ref, g_ref, b_ref, o_ref, *, eps, inv_c, epilogue_dtype):
    # x_ref/o_ref: (Bt, C, TL); g_ref/b_ref: (1, C, 1), resident across grid steps.
    x = x_ref[...].astype(jnp.float32)

    # Two-pass moments (mean, then squared deviations): matches torch.var and
    # avoids E[x^2]-E[x]^2 cancellation.  Extra VPU/XLU work hides under HBM DMA.
    mean = jnp.sum(x, axis=1, keepdims=True) * inv_c          # (Bt, 1, TL)
    d = x - mean
    var = jnp.sum(d * d, axis=1, keepdims=True) * inv_c       # biased variance
    inv = jax.lax.rsqrt(var + eps)                            # EUP slot -> ~free

    xhat = d * inv                                            # normalize in f32
    # Scale/shift epilogue at the input width (bf16 on v6e/v7x; f32 otherwise).
    g = g_ref[...].astype(epilogue_dtype)
    b = b_ref[...].astype(epilogue_dtype)
    y = xhat.astype(epilogue_dtype) * g + b
    o_ref[...] = y.astype(o_ref.dtype)


def _largest_divisor_leq(n, cap):
    cap = max(1, min(n, cap))
    for d in range(cap, 0, -1):
        if n % d == 0:
            return d
    return 1


def _choose_tiling(B, C, L, itemsize, block_l):
    """Pick (Bt, TL, buffer_count, vmem_limit_bytes)."""
    c_pad = -(-C // _SUBLANE) * _SUBLANE
    elem = int(itemsize)                           # actual width (bf16 not inflated)
    row_bytes = c_pad * L * elem                   # one full-length batch row

    if block_l is not None:
        if block_l != L and block_l % _LANE != 0:
            raise ValueError(
                f"block_l must equal L ({L}) or be a multiple of {_LANE}; got {block_l}")
        tl = block_l
    elif row_bytes <= _PER_BUF_TARGET:
        tl = L                                     # contiguous (Bt, C, L) slabs
    else:
        # Single row too large: lane-dense multiple-of-128 tiles, budget-derived
        # (no arbitrary cap).  Floored at 128; huge-C overshoot handled below.
        tl = (_PER_BUF_TARGET // (c_pad * elem)) // _LANE * _LANE
        tl = max(tl, _LANE)
        tl = min(tl, -(-L // _LANE) * _LANE)

    buf_bytes = c_pad * tl * elem
    n_lt = pl.cdiv(L, tl)

    # Fold batch rows until each buffer hits the ~2 MiB target (even when C >= 8).
    bt = _largest_divisor_leq(B, max(1, _PER_BUF_TARGET // max(buf_bytes, 1)))
    # v7x megacore: keep >= _MIN_GRID_STEPS parallel steps when that does not
    # shrink blocks below the ~1 MiB DMA sweet spot.
    while bt > 1 and (B // bt) * n_lt < _MIN_GRID_STEPS:
        smaller = _largest_divisor_leq(B, bt - 1)
        if smaller * buf_bytes < _MIN_SPLIT_BUF:
            break
        bt = smaller

    block_bytes = bt * buf_bytes
    buffer_count = 2
    vmem_limit = _VMEM_LIMIT
    headroom = 8 * 1024 * 1024                     # f32 temporaries + g/b + slack
    if 4 * block_bytes > _VMEM_LIMIT - headroom:   # 2 in + 2 out buffers too big
        buffer_count = 1                            # huge-C floor: single-buffer
        vmem_limit = min(max(_VMEM_LIMIT, 2 * block_bytes + headroom),
                         48 * 1024 * 1024)         # stay under v7x's 64 MiB
        # TODO(synk): C so large that even single-buffered TL=128 blocks exceed
        # ~48 MiB needs a C-tiled two-pass kernel; out of scope here.
    return bt, tl, buffer_count, vmem_limit


def _layer_norm_call(x, g, b, eps, block_l):
    B, C, L = x.shape
    bt, tl, nbuf, vmem_limit = _choose_tiling(B, C, L, x.dtype.itemsize, block_l)
    n_bg = B // bt
    n_lt = pl.cdiv(L, tl)

    epilogue_dtype = jnp.bfloat16 if x.dtype == jnp.bfloat16 else jnp.float32
    kernel = functools.partial(_layernorm_kernel, eps=float(eps), inv_c=1.0 / C,
                               epilogue_dtype=epilogue_dtype)

    big_kwargs = {} if nbuf == 2 else {"pipeline_mode": pl.Buffered(nbuf)}
    x_spec = pl.BlockSpec((bt, C, tl), lambda bg, lt: (bg, 0, lt), **big_kwargs)
    o_spec = pl.BlockSpec((bt, C, tl), lambda bg, lt: (bg, 0, lt), **big_kwargs)
    gb_spec = pl.BlockSpec((1, C, 1), lambda bg, lt: (0, 0, 0))   # resident, DMA'd once

    cost = pl.CostEstimate(
        flops=int(7 * B * C * L),
        transcendentals=int(B * L),                 # one rsqrt per (b, l) column
        bytes_accessed=int(2 * B * C * L * x.dtype.itemsize + 2 * C * g.dtype.itemsize),
    )
    return pl.pallas_call(
        kernel,
        out_shape=jax.ShapeDtypeStruct((B, C, L), x.dtype),
        grid=(n_bg, n_lt),
        in_specs=[x_spec, gb_spec, gb_spec],
        out_specs=o_spec,
        compiler_params=pltpu.CompilerParams(
            dimension_semantics=("parallel", "parallel"),
            vmem_limit_bytes=int(vmem_limit),
        ),
        cost_estimate=cost,
    )(x, g, b)


def layer_norm(x, g, b, eps=1e-5, *, block_l=None):
    """x: (B, C, L); g, b: (1, C, 1).  Normalizes over C (biased var), like the module."""
    B, C, L = x.shape
    assert g.shape == (1, C, 1) and b.shape == (1, C, 1)

    if block_l is None and L < _LANE and B > 1:
        # Lane-dense restructure for short L: fold B*L onto the lane axis (C stays
        # on sublanes) so the kernel's stores are unmasked and lane utilization is
        # full.  The wrapper transpose is an extra XLA pass; callers that control
        # the layout should feed length-major data directly.
        xt = jnp.swapaxes(x, 0, 1).reshape(1, C, B * L)
        out = _layer_norm_call(xt, g, b, eps, None)
        return jnp.swapaxes(out.reshape(C, B, L), 0, 1)
    return _layer_norm_call(x, g, b, eps, block_l)


if __name__ == "__main__":
    key = jax.random.PRNGKey(0)
    k1, k2, k3 = jax.random.split(key, 3)

    def ref_ln(x, g, b, eps=1e-5):
        mean = jnp.mean(x, axis=1, keepdims=True)
        var = jnp.mean((x - mean) ** 2, axis=1, keepdims=True)
        return (x - mean) / jnp.sqrt(var + eps) * g + b

    # Case 1: module-sized toy shape (B=2, C=4, L=16).  Exercises the small-L
    # lane-dense restructure (B*L folded onto the lane axis).
    B, C, L = 2, 4, 16
    x = jax.random.normal(k1, (B, C, L), dtype=jnp.float32)
    g = jnp.ones((1, C, 1), dtype=jnp.float32)    # matches nn.Parameter(torch.ones(1, dim, 1))
    b = jnp.zeros((1, C, 1), dtype=jnp.float32)   # matches nn.Parameter(torch.zeros(1, dim, 1))
    out = jax.block_until_ready(layer_norm(x, g, b, eps=1e-5))
    assert out.shape == (B, C, L)
    assert jnp.allclose(out, ref_ln(x, g, b), atol=1e-4, rtol=1e-4), "case1 mismatch"

    # Case 2: explicit length tiling (validated block_l, partial last 128-tile).
    B2, C2, L2 = 2, 8, 320
    x2 = jax.random.normal(k2, (B2, C2, L2), dtype=jnp.float32)
    g2 = (0.5 + 0.1 * jnp.arange(C2, dtype=jnp.float32)).reshape(1, C2, 1)
    b2 = (0.01 * jnp.arange(C2, dtype=jnp.float32) - 0.02).reshape(1, C2, 1)
    out2 = jax.block_until_ready(layer_norm(x2, g2, b2, eps=1e-5, block_l=128))
    assert jnp.allclose(out2, ref_ln(x2, g2, b2), atol=1e-4, rtol=1e-4), "case2 mismatch"

    # Case 3: default tiling -- contiguous full-L blocks with budget-driven batch
    # folding; non-zero mean stresses the two-pass variance path.
    B3, C3, L3 = 4, 32, 256
    x3 = jax.random.normal(k3, (B3, C3, L3), dtype=jnp.float32) * 3.0 + 5.0
    g3 = jnp.ones((1, C3, 1), dtype=jnp.float32)
    b3 = jnp.zeros((1, C3, 1), dtype=jnp.float32)
    out3 = jax.block_until_ready(layer_norm(x3, g3, b3, eps=1e-5))
    assert jnp.allclose(out3, ref_ln(x3, g3, b3), atol=1e-4, rtol=1e-4), "case3 mismatch"

    print("KERNEL_OK")
</pallas_src>

<mosaic_0001>
module attributes {stable_mosaic.version = 11 : i64} {
  func.func @_layernorm_kernel(%arg0: i32, %arg1: i32, %arg2: memref<1x4x32xf32, #tpu.memory_space<vmem>>, %arg3: memref<1x4x1xf32, #tpu.memory_space<vmem>>, %arg4: memref<1x4x1xf32, #tpu.memory_space<vmem>>, %arg5: memref<1x4x32xf32, #tpu.memory_space<vmem>>) attributes {dimension_semantics = [#tpu.dimension_semantics<parallel>, #tpu.dimension_semantics<parallel>], iteration_bounds = array<i64: 1, 1>, scalar_prefetch = 0 : i64, scratch_operands = 0 : i64, tpu.core_type = #tpu.core_type<tc>, window_params = [{transform_indices = @transform_0, window_bounds = array<i64: 1, 4, 32>}, {pipeline_mode = #tpu.pipeline_mode<synchronous>, transform_indices = @transform_1, window_bounds = array<i64: 1, 4, 1>}, {pipeline_mode = #tpu.pipeline_mode<synchronous>, transform_indices = @transform_2, window_bounds = array<i64: 1, 4, 1>}, {transform_indices = @transform_3, window_bounds = array<i64: 1, 4, 32>}]} {
    %c0 = arith.constant 0 : index
    %c0_0 = arith.constant 0 : index
    %c0_1 = arith.constant 0 : index
    %0 = vector.load %arg2[%c0, %c0_0, %c0_1] : memref<1x4x32xf32, #tpu.memory_space<vmem>>, vector<1x4x32xf32>
    %cst = arith.constant dense<0.000000e+00> : vector<1x32xf32>
    %1 = vector.multi_reduction <add>, %0, %cst [1] : vector<1x4x32xf32> to vector<1x32xf32>
    %2 = vector.shape_cast %1 : vector<1x32xf32> to vector<1x1x32xf32>
    %cst_2 = arith.constant 2.500000e-01 : f32
    %3 = vector.broadcast %cst_2 : f32 to vector<1x1x32xf32>
    %4 = arith.mulf %2, %3 : vector<1x1x32xf32>
    %5 = vector.broadcast %4 : vector<1x1x32xf32> to vector<1x4x32xf32>
    %6 = arith.subf %0, %5 : vector<1x4x32xf32>
    %7 = arith.mulf %6, %6 : vector<1x4x32xf32>
    %cst_3 = arith.constant dense<0.000000e+00> : vector<1x32xf32>
    %8 = vector.multi_reduction <add>, %7, %cst_3 [1] : vector<1x4x32xf32> to vector<1x32xf32>
    %9 = vector.shape_cast %8 : vector<1x32xf32> to vector<1x1x32xf32>
    %cst_4 = arith.constant 2.500000e-01 : f32
    %10 = vector.broadcast %cst_4 : f32 to vector<1x1x32xf32>
    %11 = arith.mulf %9, %10 : vector<1x1x32xf32>
    %cst_5 = arith.constant 9.99999974E-6 : f32
    %12 = vector.broadcast %cst_5 : f32 to vector<1x1x32xf32>
    %13 = arith.addf %11, %12 : vector<1x1x32xf32>
    %14 = math.rsqrt %13 : vector<1x1x32xf32>
    %15 = vector.broadcast %14 : vector<1x1x32xf32> to vector<1x4x32xf32>
    %16 = arith.mulf %6, %15 : vector<1x4x32xf32>
    %c0_6 = arith.constant 0 : index
    %c0_7 = arith.constant 0 : index
    %c0_8 = arith.constant 0 : index
    %17 = vector.load %arg3[%c0_6, %c0_7, %c0_8] : memref<1x4x1xf32, #tpu.memory_space<vmem>>, vector<1x4x1xf32>
    %c0_9 = arith.constant 0 : index
    %c0_10 = arith.constant 0 : index
    %c0_11 = arith.constant 0 : index
    %18 = vector.load %arg4[%c0_9, %c0_10, %c0_11] : memref<1x4x1xf32, #tpu.memory_space<vmem>>, vector<1x4x1xf32>
    %19 = vector.broadcast %17 : vector<1x4x1xf32> to vector<1x4x32xf32>
    %20 = arith.mulf %16, %19 : vector<1x4x32xf32>
    %21 = vector.broadcast %18 : vector<1x4x1xf32> to vector<1x4x32xf32>
    %22 = arith.addf %20, %21 : vector<1x4x32xf32>
    %c0_12 = arith.constant 0 : index
    %c0_13 = arith.constant 0 : index
    %c0_14 = arith.constant 0 : index
    %23 = vector.load %arg5[%c0_12, %c0_13, %c0_14] : memref<1x4x32xf32, #tpu.memory_space<vmem>>, vector<1x4x32xf32>
    tpu.vector_store %arg5[%c0_12, %c0_13, %c0_14], %22 {strides = array<i32>} : memref<1x4x32xf32, #tpu.memory_space<vmem>>, vector<1x4x32xf32>,
    return
  }
  func.func @transform_0(%arg0: i32, %arg1: i32) -> (i32, i32, i32) {
    %c0_i32 = arith.constant 0 : i32
    %c0_i32_0 = arith.constant 0 : i32
    return %arg0, %c0_i32, %arg1 : i32, i32, i32
  }
  func.func @transform_1(%arg0: i32, %arg1: i32) -> (i32, i32, i32) {
    %c0_i32 = arith.constant 0 : i32
    %c0_i32_0 = arith.constant 0 : i32
    %c0_i32_1 = arith.constant 0 : i32
    %c0_i32_2 = arith.constant 0 : i32
    return %c0_i32, %c0_i32_0, %c0_i32_1 : i32, i32, i32
  }
  func.func @transform_2(%arg0: i32, %arg1: i32) -> (i32, i32, i32) {
    %c0_i32 = arith.constant 0 : i32
    %c0_i32_0 = arith.constant 0 : i32
    %c0_i32_1 = arith.constant 0 : i32
    %c0_i32_2 = arith.constant 0 : i32
    return %c0_i32, %c0_i32_0, %c0_i32_1 : i32, i32, i32
  }
  func.func @transform_3(%arg0: i32, %arg1: i32) -> (i32, i32, i32) {
    %c0_i32 = arith.constant 0 : i32
    %c0_i32_0 = arith.constant 0 : i32
    return %arg0, %c0_i32, %arg1 : i32, i32, i32
  }
}

</mosaic_0001>

<bundles_post_ra>
// kernel: tpu_custom_call.1
= control target key start
LH: loop header
LB: loop body
LE: loop exit
PB: predicated region body
PF: predicated region fallthrough
CT: control target
= control target key end

     0   :  { %v94_v1 = vmov 0   ;;  %s131_s0 = inlined_call_operand.vmem [shape: f32[1,4,32], index: 0, kind: input, shape index: {}]   ;;  %s132_s1 = inlined_call_operand.vmem [shape: f32[1,4,1], index: 1, kind: input, shape index: {}]   ;;  %s133_s2 = inlined_call_operand.vmem [shape: f32[1,4,1], index: 2, kind: input, shape index: {}]   ;;  %s134_s3 = inlined_call_operand.hbm [shape: f32[1,4,32], index: 3, kind: output, shape index: {}]  }
   0x1   :  { %v38_v0 = vld [vmem:[%s132_s1] sm:$0xf]  ;;  %69 = vset.pattern.permute.xlu0 %v94_v1 }
   0x2   :  { %8 = vsyncpa [#allocation3], 0  ;;  %42 = vperm.xlu0 %69, %v38_v0   ;;  %v39_v2 = vld [vmem:[%s133_s2] sm:$0xf]  ;;  %vm16_vm0 = vcmask 257024  }
   0x3   :  { %v15_v3 = vld [vmem:[%s131_s0] sm:$0xf]  ;;  %s95_s0 = smov [#allocation2]  }
   0x4   :  { %v17_v4 = vsel %vm16_vm0, %v15_v3, 0.0  ;;  %s59_s1 = sshll.u32 %s95_s0, 4  ;;  %s60_s1 = int_to_ptr.vmem [resolvable:$true] %s59_s1 }
   0x5   :  { %v18_v5 = vrot.slane %v17_v4, 4  ;;  %s72_s2 = scalar_lea.vmem %s60_s1, 64  ;;  %p77_p1 = scmp.lt.s32.totalorder %s60_s1, %s60_s1 }
   0x6   :  { %48 = vperm.xlu0 %69, %v39_v2   ;;  %p73_p0 = scmp.ne.s32.totalorder %s60_s1, %s72_s2  ;;  %p78_p2 = scmp.lt.s32.totalorder %s72_s2, %s72_s2 }
   0x7   :  { %v19_v6 = vadd.f32 %v18_v5, %v17_v4 }
   0x8   :  { %p79_p3 = por %p78_p2, %p77_p1 }
   0x9   :  { %v20_v7 = vrot.slane %v19_v6, 2 }
   0xa   :  { %p80_p4 = pnand %p79_p3, %p73_p0 }
   0xb   :  { %v21_v8 = vadd.f32 %v20_v7, %v19_v6 }
   0xd   :  { %v22_v9 = vrot.slane %v21_v8, 1 }
   0xf   :  { %v23_v10 = vadd.f32 %v22_v9, %v21_v8 }
  0x11   :  { %v24_v11 = vmul.f32 0.25, %v23_v10 }
  0x13   :  { %v25_v12 = vsub.f32 %v15_v3, %v24_v11 }
  0x15   :  { %v26_v13 = vmul.f32 %v25_v12, %v25_v12 }
  0x17   :  { %v27_v14 = vsel %vm16_vm0, %v26_v13, 0.0 }
  0x18   :  { %v28_v15 = vrot.slane %v27_v14, 4 }
  0x1a   :  { %v29_v16 = vadd.f32 %v28_v15, %v27_v14 }
  0x1c   :  { %v30_v17 = vrot.slane %v29_v16, 2 }
  0x1e   :  { %v31_v18 = vadd.f32 %v30_v17, %v29_v16 }
  0x20   :  { %v32_v19 = vrot.slane %v31_v18, 1 }
  0x22   :  { %v33_v20 = vadd.f32 %v32_v19, %v31_v18 }
  0x24   :  { %v34_v21 = vmul.f32 0.25, %v33_v20 }
  0x26   :  { %v35_v22 = vadd.f32 1e-05, %v34_v21 }
  0x28   :  { %70 = vrsqrt.f32 %v35_v22 }
  0x35   :  { %v71_v23 = vpop.eup %70 }
  0x36   :  { %v37_v24 = vmul.f32 %v71_v23, %v25_v12 }
  0x7d   :  { %v43_v25 = vpop.permute.xlu0 %42 }
  0x7e   :  { %v45_v26 = vmul.f32 %v43_v25, %v37_v24 }
  0x81   :  { %v49_v27 = vpop.permute.xlu0 %48 }
  0x82   :  { %v51_v28 = vadd.f32 %v49_v27, %v45_v26 }
  0x84   :  { %52 = vst.msk [vmem:[#allocation2] sm:$0xf] %vm16_vm0, %v51_v28 }
  0x85   :  { %83 = shalt.err (!%p80_p4)
}
  0x86   :  { %62 = dma.vmem_to_hbm [thread:$0]  %s60_s1, 64, %s134_s3, [#allocation3]  }
  0x87   :  { %92 = dma.done.wait [#allocation3], 64  }
  0x88   :  { %93 = vsyncadd [#allocation3], 4294967232 }
  0x89   :  { %66 = vsyncpa [#allocation3], 1 }

</bundles_post_ra>
